<compile_context>
chip_gen: v6e
topology: v6e:2x2x1
jax: 0.10.0
libtpu: 0.0.40
codegen_flags: <defaults>
</compile_context>

<pallas_src>
import math

import jax
import jax.numpy as jnp
from jax.experimental import pallas as pl
from jax.experimental.pallas import tpu as pltpu


def _round_up(x: int, m: int) -> int:
    return ((x + m - 1) // m) * m


def _vmem_limit_bytes() -> int:
    """Capacity-aware scoped-VMEM limit: large tiles, but headroom on v7x."""
    try:
        cap = pltpu.get_tpu_info().vmem_capacity_bytes
        return int(min(96 << 20, max(cap - (16 << 20), 32 << 20)))
    except Exception:
        return 48 << 20  # safe on v5e/v6e (128 MiB phys) and v7x (64 MiB phys)


# ---------------------------------------------------------------------------
# Kernels
# ---------------------------------------------------------------------------
def _proj_kernel_2d(x_ref, w_ref, b_ref, o_ref):
    """Whole-K tile: one MXU matmul, bias fused, no scratch accumulator."""
    acc = jnp.dot(x_ref[...], w_ref[...], preferred_element_type=jnp.float32)
    o_ref[...] = (acc + b_ref[...].astype(jnp.float32)).astype(o_ref.dtype)


def _proj_kernel_3d(x_ref, w_ref, b_ref, o_ref, acc_ref):
    """K-reduction fallback for very large d_model (K split over grid axis 2)."""
    k = pl.program_id(2)

    @pl.when(k == 0)
    def _():
        # Accumulator initialized with the broadcast bias -> no finalize add.
        acc_ref[...] = jnp.broadcast_to(
            b_ref[...].astype(jnp.float32), acc_ref.shape
        )

    acc_ref[...] += jnp.dot(
        x_ref[...], w_ref[...], preferred_element_type=jnp.float32
    )

    @pl.when(k == pl.num_programs(2) - 1)
    def _():
        o_ref[...] = acc_ref[...].astype(o_ref.dtype)


# ---------------------------------------------------------------------------
# One-time parameter preparation (hoisted out of the per-forward hot path)
# ---------------------------------------------------------------------------
def prepare_projection_params(weight, bias, *, tn=1024, tk_max=4096,
                              param_dtype=jnp.bfloat16):
    """Transpose nn.Linear's (V, K) weight to MXU-friendly (K, V), zero-pad to
    tile multiples and cast to bf16, ONCE.  Bias stays fp32 (it is added to
    the fp32 accumulator)."""
    V, K = weight.shape
    assert bias.shape == (V,)

    tn_e = min(tn, _round_up(V, 128))
    Vp = _round_up(V, tn_e)

    Kp_small = _round_up(K, 128)
    if Kp_small <= tk_max:
        Kp, tk_e = Kp_small, Kp_small            # K fits: no reduction grid axis
    else:
        Kp, tk_e = _round_up(K, tk_max), tk_max  # K split over a reduction axis

    w_kv = jnp.pad(weight.T.astype(param_dtype), ((0, Kp - K), (0, Vp - V)))
    b_row = jnp.pad(bias.astype(jnp.float32), (0, Vp - V)).reshape(1, Vp)
    return {"w": w_kv, "b": b_row, "K": K, "V": V,
            "Kp": Kp, "Vp": Vp, "tn": tn_e, "tk": tk_e}


# ---------------------------------------------------------------------------
# Forward
# ---------------------------------------------------------------------------
def projection_forward(x, params, *, tm=512, out_dtype=None,
                       compute_dtype=jnp.bfloat16):
    """ProjectionLayer.forward: x (B, S, d_model) -> logits (B, S, V)."""
    B, S, D = x.shape
    assert D == params["K"], (D, params["K"])
    V, Kp, Vp = params["V"], params["Kp"], params["Vp"]
    tn, tk = params["tn"], params["tk"]
    out_dtype = x.dtype if out_dtype is None else out_dtype

    M = B * S
    tm_e = min(tm, _round_up(M, 8))
    Mp = _round_up(M, tm_e)

    x2d = jnp.pad(x.reshape(M, D).astype(compute_dtype),
                  ((0, Mp - M), (0, Kp - D)))
    w, b = params["w"], params["b"]

    n_j, n_i, n_k = Vp // tn, Mp // tm_e, Kp // tk
    out_bytes = Mp * Vp * jnp.dtype(out_dtype).itemsize
    cost = pl.CostEstimate(
        flops=2 * Mp * Kp * Vp,
        transcendentals=0,
        bytes_accessed=(x2d.size * x2d.dtype.itemsize
                        + w.size * w.dtype.itemsize
                        + b.size * 4 + out_bytes),
    )
    vmem_limit = _vmem_limit_bytes()

    if n_k == 1:
        # Common case: entire d_model in one tile.  Pure 2-D parallel grid;
        # vocab outermost so the (Kp, tn) W strip's block index does not change
        # across the inner row axis (weight stays VMEM-resident).
        out = pl.pallas_call(
            _proj_kernel_2d,
            out_shape=jax.ShapeDtypeStruct((Mp, Vp), out_dtype),
            grid_spec=pltpu.PrefetchScalarGridSpec(
                num_scalar_prefetch=0,
                grid=(n_j, n_i),
                in_specs=[
                    pl.BlockSpec((tm_e, Kp), lambda j, i: (i, 0)),  # x rows
                    pl.BlockSpec((Kp, tn), lambda j, i: (0, j)),    # W strip
                    pl.BlockSpec((1, tn), lambda j, i: (0, j)),     # bias row
                ],
                out_specs=pl.BlockSpec((tm_e, tn), lambda j, i: (i, j)),
            ),
            compiler_params=pltpu.CompilerParams(
                dimension_semantics=("parallel", "parallel"),
                vmem_limit_bytes=vmem_limit,
            ),
            cost_estimate=cost,
        )(x2d, w, b)
    else:
        # Fallback: huge d_model.  K-reduction as the LAST ("arbitrary") axis,
        # fp32 accumulator initialized with the bias at k == 0.
        out = pl.pallas_call(
            _proj_kernel_3d,
            out_shape=jax.ShapeDtypeStruct((Mp, Vp), out_dtype),
            grid_spec=pltpu.PrefetchScalarGridSpec(
                num_scalar_prefetch=0,
                grid=(n_j, n_i, n_k),
                in_specs=[
                    pl.BlockSpec((tm_e, tk), lambda j, i, k: (i, k)),
                    pl.BlockSpec((tk, tn), lambda j, i, k: (k, j)),
                    pl.BlockSpec((1, tn), lambda j, i, k: (0, j)),
                ],
                out_specs=pl.BlockSpec((tm_e, tn), lambda j, i, k: (i, j)),
                scratch_shapes=[pltpu.VMEM((tm_e, tn), jnp.float32)],
            ),
            compiler_params=pltpu.CompilerParams(
                dimension_semantics=("parallel", "parallel", "arbitrary"),
                vmem_limit_bytes=vmem_limit,
            ),
            cost_estimate=cost,
        )(x2d, w, b)

    return out[:M, :V].reshape(B, S, V)


if __name__ == "__main__":
    key = jax.random.PRNGKey(0)
    batch, seq, d_model, vocab_size = 2, 8, 32, 64

    k1, k2, k3 = jax.random.split(key, 3)
    x = jax.random.normal(k1, (batch, seq, d_model), dtype=jnp.float32)

    # Deterministic nn.Linear-style init: U(-1/sqrt(d_model), 1/sqrt(d_model)).
    bound = 1.0 / math.sqrt(d_model)
    weight = jax.random.uniform(
        k2, (vocab_size, d_model), jnp.float32, minval=-bound, maxval=bound
    )
    bias = jax.random.uniform(
        k3, (vocab_size,), jnp.float32, minval=-bound, maxval=bound
    )

    # One-time weight prep (mirrors holding the nn.Linear parameters).
    params = prepare_projection_params(weight, bias)

    out = projection_forward(x, params)
    out = jax.block_until_ready(out)
    assert out.shape == (batch, seq, vocab_size)

    # Reference with the same bf16 rounding of x / W (fp32 accumulation).
    xb = x.astype(jnp.bfloat16).astype(jnp.float32)
    wb = weight.astype(jnp.bfloat16).astype(jnp.float32)
    ref = (
        jnp.einsum("bsd,vd->bsv", xb, wb, precision=jax.lax.Precision.HIGHEST)
        + bias
    )
    err = float(jnp.max(jnp.abs(out.astype(jnp.float32) - ref)))
    assert jnp.allclose(out.astype(jnp.float32), ref, atol=2e-2, rtol=2e-2), err

    print("KERNEL_OK")
</pallas_src>

<mosaic_0001>
module attributes {stable_mosaic.version = 11 : i64} {
  func.func @_proj_kernel_2d(%arg0: i32, %arg1: i32, %arg2: memref<16x128xbf16, #tpu.memory_space<vmem>>, %arg3: memref<128x128xbf16, #tpu.memory_space<vmem>>, %arg4: memref<1x128xf32, #tpu.memory_space<vmem>>, %arg5: memref<16x128xf32, #tpu.memory_space<vmem>>) attributes {dimension_semantics = [#tpu.dimension_semantics<parallel>, #tpu.dimension_semantics<parallel>], iteration_bounds = array<i64: 1, 1>, scalar_prefetch = 0 : i64, scratch_operands = 0 : i64, tpu.core_type = #tpu.core_type<tc>, window_params = [{transform_indices = @transform_0, window_bounds = array<i64: 16, 128>}, {transform_indices = @transform_1, window_bounds = array<i64: 128, 128>}, {transform_indices = @transform_2, window_bounds = array<i64: 1, 128>}, {transform_indices = @transform_3, window_bounds = array<i64: 16, 128>}]} {
    %c0 = arith.constant 0 : index
    %c0_0 = arith.constant 0 : index
    %0 = vector.load %arg2[%c0, %c0_0] : memref<16x128xbf16, #tpu.memory_space<vmem>>, vector<16x128xbf16>
    %c0_1 = arith.constant 0 : index
    %c0_2 = arith.constant 0 : index
    %1 = vector.load %arg3[%c0_1, %c0_2] : memref<128x128xbf16, #tpu.memory_space<vmem>>, vector<128x128xbf16>
    %cst = arith.constant dense<0.000000e+00> : vector<16x128xf32>
    %2 = tpu.matmul %0, %1, %cst {dimension_numbers = #tpu.dot_dimension_numbers<[1], [0], [0], [1], [0, 0, 1, 1], [], []>} : vector<16x128xbf16>, vector<128x128xbf16>, vector<16x128xf32> -> vector<16x128xf32>
    %c0_3 = arith.constant 0 : index
    %c0_4 = arith.constant 0 : index
    %3 = vector.load %arg4[%c0_3, %c0_4] : memref<1x128xf32, #tpu.memory_space<vmem>>, vector<1x128xf32>
    %4 = vector.broadcast %3 : vector<1x128xf32> to vector<16x128xf32>
    %5 = arith.addf %2, %4 : vector<16x128xf32>
    %c0_5 = arith.constant 0 : index
    %c0_6 = arith.constant 0 : index
    %6 = vector.load %arg5[%c0_5, %c0_6] : memref<16x128xf32, #tpu.memory_space<vmem>>, vector<16x128xf32>
    tpu.vector_store %arg5[%c0_5, %c0_6], %5 {strides = array<i32>} : memref<16x128xf32, #tpu.memory_space<vmem>>, vector<16x128xf32>,
    return
  }
  func.func @transform_0(%arg0: i32, %arg1: i32) -> (i32, i32) {
    %c0_i32 = arith.constant 0 : i32
    %c0_i32_0 = arith.constant 0 : i32
    return %arg1, %c0_i32 : i32, i32
  }
  func.func @transform_1(%arg0: i32, %arg1: i32) -> (i32, i32) {
    %c0_i32 = arith.constant 0 : i32
    %c0_i32_0 = arith.constant 0 : i32
    return %c0_i32, %arg0 : i32, i32
  }
  func.func @transform_2(%arg0: i32, %arg1: i32) -> (i32, i32) {
    %c0_i32 = arith.constant 0 : i32
    %c0_i32_0 = arith.constant 0 : i32
    return %c0_i32, %arg0 : i32, i32
  }
  func.func @transform_3(%arg0: i32, %arg1: i32) -> (i32, i32) {
    %c0_i32 = arith.constant 0 : i32
    return %arg1, %arg0 : i32, i32
  }
}

</mosaic_0001>

<bundles_post_ra>
// kernel: tpu_custom_call.1
= control target key start
LH: loop header
LB: loop body
LE: loop exit
PB: predicated region body
PF: predicated region fallthrough
CT: control target
= control target key end

     0   :  { %8 = vsyncpa [#allocation3], 0  ;;  %s348_s0 = inlined_call_operand.hbm [shape: bf16[16,128], index: 0, kind: input, shape index: {}]   ;;  %s349_s1 = inlined_call_operand.hbm [shape: bf16[128,128], index: 1, kind: input, shape index: {}]   ;;  %s350_s2 = inlined_call_operand.vmem [shape: f32[1,128], index: 2, kind: input, shape index: {}]   ;;  %s351_s3 = inlined_call_operand.hbm [shape: f32[16,128], index: 3, kind: output, shape index: {}]  }
   0x1   :  { %9 = vsyncpa [#allocation6], 0 }
   0x2   :  { %10 = vsyncpa [#allocation4], 0  ;;  %s307_s12 = smov [#allocation2]  }
   0x3   :  { %s16_s13 = sshll.u32 %s307_s12, 4  ;;  %s17_s13 = int_to_ptr.vmem [resolvable:$true] %s16_s13 }
   0x4   :  { %s249_s14 = scalar_lea.vmem %s17_s13, 128  ;;  %p254_p1 = scmp.lt.s32.totalorder %s17_s13, %s17_s13 }
   0x5   :  { %p250_p0 = scmp.ne.s32.totalorder %s17_s13, %s249_s14  ;;  %p255_p2 = scmp.lt.s32.totalorder %s249_s14, %s249_s14 }
   0x7   :  { %p256_p3 = por %p255_p2, %p254_p1 }
   0x9   :  { %p257_p4 = pnand %p256_p3, %p250_p0 }
   0xb   :  { %260 = shalt.err (!%p257_p4)
}
   0xc   :  { %s308_s15 = smov 64   ;;  %s309_s16 = smov 4  }
   0xd   :  { %22 = dma.hbm_to_vmem [thread:$0]  %s348_s0, 128, %s17_s13, [#allocation3], %s308_s15, %s308_s15, %s309_s16  }
   0xe   :  { %s310_s19 = smov [#allocation5]  }
   0xf   :  { %s28_s20 = sshll.u32 %s310_s19, 4  ;;  %s29_s20 = int_to_ptr.vmem [resolvable:$true] %s28_s20 }
  0x10   :  { %s269_s21 = scalar_lea.vmem %s29_s20, 1024  ;;  %p274_p6 = scmp.lt.s32.totalorder %s29_s20, %s29_s20 }
  0x11   :  { %p270_p5 = scmp.ne.s32.totalorder %s29_s20, %s269_s21  ;;  %p275_p7 = scmp.lt.s32.totalorder %s269_s21, %s269_s21 }
  0x13   :  { %p276_p8 = por %p275_p7, %p274_p6 }
  0x15   :  { %p277_p9 = pnand %p276_p8, %p270_p5 }
  0x17   :  { %280 = shalt.err (!%p277_p9)
}
  0x18   :  { %34 = dma.hbm_to_vmem [thread:$0]  %s349_s1, 1024, %s29_s20, [#allocation6], %s308_s15, %s308_s15, %s309_s16  }
  0x19   :  { %301 = dma.done.wait [#allocation3], 128  }
  0x1a   :  { %302 = vsyncadd [#allocation3], 4294967168 }
  0x1b   :  { %303 = dma.done.wait [#allocation6], 1024  }
  0x1c   :  { %304 = vsyncadd [#allocation6], 4294966272  ;;  %v311_v0 = vmov 0.0   ;;  %vm312_vm0 = vmmov 0   ;;  %v232_v1 = vld [vmem:[#allocation5 + $0x38] sm:$0xff]   ;;  %v233_v2 = vld [vmem:[#allocation5 + $0x30] sm:$0xff]  }
  0x1d   :  { %203 = vmatprep.subr.bf16.mxu0 %v311_v0  ;;  %219 = vmatprep.mubr.msk.bf16.mxu0 %vm312_vm0, %v311_v0  ;;  %v234_v3 = vld [vmem:[#allocation5 + $0x28] sm:$0xff]   ;;  %v235_v4 = vld [vmem:[#allocation5 + $0x20] sm:$0xff]   ;;  %v236_v5 = vld [vmem:[#allocation5 + $0x18] sm:$0xff]   ;;  %s313_s24 = smov [#allocation7]  }
  0x1e   :  { %204 = vmatpush3.bf16.msra.mxu0 %v232_v1  ;;  %v237_v6 = vld [vmem:[#allocation5 + $0x10] sm:$0xff]   ;;  %v238_v7 = vld [vmem:[#allocation5 + $0x8] sm:$0xff]   ;;  %v239_v8 = vld [vmem:[#allocation5] sm:$0xff]   ;;  %s171_s25 = sshll.u32 %s313_s24, 4  ;;  %s172_s25 = int_to_ptr.vmem [resolvable:$true] %s171_s25 }
  0x1f   :  { %205 = vmatprep.subr.bf16.mxu0 %v311_v0  ;;  %v240_v9 = vld [vmem:[#allocation2] sm:$0xff]   ;;  %s281_s26 = scalar_lea.vmem %s172_s25, 256  ;;  %p286_p11 = scmp.lt.s32.totalorder %s172_s25, %s172_s25 }
  0x20   :  { %v184_v10 = vld [vmem:[%s350_s2] ss:$0 sm:$0xff]  ;;  %p282_p10 = scmp.ne.s32.totalorder %s172_s25, %s281_s26  ;;  %p287_p12 = scmp.lt.s32.totalorder %s281_s26, %s281_s26 }
  0x22   :  { %206 = vmatpush3.bf16.msra.mxu0 %v233_v2  ;;  %p288_p13 = por %p287_p12, %p286_p11 }
  0x23   :  { %207 = vmatprep.subr.bf16.mxu0 %v311_v0 }
  0x24   :  { %p289_p0 = pnand %p288_p13, %p282_p10 }
  0x26   :  { %208 = vmatpush3.bf16.msra.mxu0 %v234_v3 }
  0x27   :  { %209 = vmatprep.subr.bf16.mxu0 %v311_v0 }
  0x2a   :  { %210 = vmatpush3.bf16.msra.mxu0 %v235_v4 }
  0x2b   :  { %211 = vmatprep.subr.bf16.mxu0 %v311_v0 }
  0x2e   :  { %212 = vmatpush3.bf16.msra.mxu0 %v236_v5 }
  0x2f   :  { %213 = vmatprep.subr.bf16.mxu0 %v311_v0 }
  0x32   :  { %214 = vmatpush3.bf16.msra.mxu0 %v237_v6 }
  0x33   :  { %215 = vmatprep.subr.bf16.mxu0 %v311_v0 }
  0x36   :  { %216 = vmatpush3.bf16.msra.mxu0 %v238_v7 }
  0x37   :  { %217 = vmatprep.subr.bf16.mxu0 %v311_v0 }
  0x3a   :  { %218 = vmatpush3.bf16.msra.mxu0 %v239_v8 }
  0x3d   :  { %220 = vmatmul.mubr.bf16.vlgmr.msra.gmra.mxu0 %v240_v9 }
  0xfd   :  { %v157_v11 = vpop.f32.mrf.mxu0 }
  0xfe   :  { %v158_v12 = vadd.f32 %v184_v10, %v157_v11 }
  0xff   :  { %v221_v13 = vpop.f32.mrf.mxu0 }
 0x100   :  { %164 = vst [vmem:[#allocation7] sm:$0xff] %v158_v12 }
 0x101   :  { %v160_v14 = vpop.f32.mrf.mxu0 }
 0x102   :  { %v161_v15 = vadd.f32 %v184_v10, %v160_v14 }
 0x103   :  { %v222_v16 = vpop.f32.mrf.mxu0 }
 0x104   :  { %165 = vst [vmem:[#allocation7 + $0x8] sm:$0xff] %v161_v15 }
 0x105   :  { %292 = shalt.err (!%p289_p0)
}
 0x106   :  { %s314_s27 = smov 128   ;;  %s315_s2 = smov 8  }
 0x107   :  { %177 = dma.vmem_to_hbm [thread:$0]  %s172_s25, 256, %s351_s3, [#allocation4], %s314_s27, %s314_s27, %s315_s2  }
 0x108   :  { %305 = dma.done.wait [#allocation4], 256  }
 0x109   :  { %306 = vsyncadd [#allocation4], 4294967040 }
 0x10a   :  { %181 = vsyncpa [#allocation3], 1 }
 0x10b   :  { %182 = vsyncpa [#allocation6], 1 }
 0x10c   :  { %183 = vsyncpa [#allocation4], 1 }

</bundles_post_ra>
